<compile_context>
chip_gen: v6e
topology: v6e:2x2x1
jax: 0.10.0
libtpu: 0.0.40
codegen_flags: <defaults>
</compile_context>

<pallas_src>
import jax
import jax.numpy as jnp
from jax.experimental import pallas as pl
from jax.experimental.pallas import tpu as pltpu

D_IN, D_H1, D_H2, D_OUT = 16, 64, 256, 1024


# ----------------------------------------------------------------------------
# Fused MLP kernel: relu(x@W1+b1) -> relu(.@W2+b2) -> .@W3+b3, all in one body.
# ----------------------------------------------------------------------------
def _generator_fc_kernel(x_ref, w1_ref, b1_ref, w2_ref, b2_ref,
                         w3_ref, b3_ref, o_ref):
    x = x_ref[...]                                            # already bf16

    h1 = jnp.dot(x, w1_ref[...], preferred_element_type=jnp.float32) + b1_ref[...]
    h1 = jnp.maximum(h1, 0.0)

    h2 = jnp.dot(h1.astype(w2_ref.dtype), w2_ref[...],
                 preferred_element_type=jnp.float32) + b2_ref[...]
    h2 = jnp.maximum(h2, 0.0)

    out = jnp.dot(h2.astype(w3_ref.dtype), w3_ref[...],
                  preferred_element_type=jnp.float32) + b3_ref[...]
    o_ref[...] = out.astype(o_ref.dtype)


def _round_up(x, m):
    return (x + m - 1) // m * m


def _choose_tiling(M, tm_max):
    """Rows per grid step (multiple of 8) and the grid length (= cdiv(M, tm))."""
    M = max(int(M), 1)
    tm_max = max(8, (int(tm_max) // 8) * 8)
    n = pl.cdiv(M, tm_max)                      # minimum #tiles under the tm cap
    if M >= 256:
        # Enough work to amortize ~0.35us/step: use an even #tiles so the
        # "parallel" M axis shards across v7x's two TensorCores.  On v5e/v6e
        # the grid is a sequential loop, so this is essentially free.
        n = _round_up(max(n, 2), 2)
    tm = min(_round_up(pl.cdiv(M, n), 8), tm_max)
    return tm, pl.cdiv(M, tm)


def generator_fc_forward(params, x, *, tm_max=1024, out_dtype=jnp.float32):
    """Forward pass of GeneratorFC. Returns (N, 1, 1024).

    out_dtype=jnp.bfloat16 halves the (dominant) output writeback traffic at the
    cost of one extra rounding step; the float32 default matches PyTorch.
    """
    compute_dtype = params["w1"].dtype
    # Cast once in the wrapper (halves the x DMA vs shipping f32 and casting
    # in-kernel); a no-op when the caller already holds bf16 activations.
    xf = x.reshape(-1, D_IN).astype(compute_dtype)            # input.view(-1, 16)
    M = xf.shape[0]
    tm, n_steps = _choose_tiling(M, tm_max)

    # Advisory cost so XLA schedules surrounding ops around a right-sized call.
    w_bytes = sum(int(params[k].size) * params[k].dtype.itemsize
                  for k in ("w1", "b1", "w2", "b2", "w3", "b3"))
    cost = pl.CostEstimate(
        flops=2 * M * (D_IN * D_H1 + D_H1 * D_H2 + D_H2 * D_OUT),
        transcendentals=0,
        bytes_accessed=(M * D_IN * xf.dtype.itemsize
                        + M * D_OUT * jnp.dtype(out_dtype).itemsize
                        + w_bytes),
    )

    out = pl.pallas_call(
        _generator_fc_kernel,
        out_shape=jax.ShapeDtypeStruct((M, D_OUT), out_dtype),   # exact M: no pad/slice copies
        grid_spec=pltpu.PrefetchScalarGridSpec(
            num_scalar_prefetch=0,
            grid=(n_steps,),
            in_specs=[
                pl.BlockSpec((tm, D_IN), lambda i: (i, 0)),        # x tile
                pl.BlockSpec((D_IN, D_H1), lambda i: (0, 0)),      # W1 (VMEM-resident)
                pl.BlockSpec((1, D_H1), lambda i: (0, 0)),         # b1
                pl.BlockSpec((D_H1, D_H2), lambda i: (0, 0)),      # W2 (VMEM-resident)
                pl.BlockSpec((1, D_H2), lambda i: (0, 0)),         # b2
                pl.BlockSpec((D_H2, D_OUT), lambda i: (0, 0)),     # W3 (VMEM-resident)
                pl.BlockSpec((1, D_OUT), lambda i: (0, 0)),        # b3
            ],
            out_specs=pl.BlockSpec((tm, D_OUT), lambda i: (i, 0)),
        ),
        compiler_params=pltpu.CompilerParams(
            dimension_semantics=("parallel",),
            vmem_limit_bytes=48 * 1024 * 1024,   # tm=1024 f32 output dbl-buffer + temps; fits every gen
        ),
        cost_estimate=cost,
    )(xf, params["w1"], params["b1"], params["w2"], params["b2"],
      params["w3"], params["b3"])

    return out.reshape(-1, 1, D_OUT)                           # .view(-1, 1, 1024)


# ----------------------------------------------------------------------------
# Parameter construction mirroring weight_init(mean=0, std=0.02):
# nn.Linear weight (out, in) ~ N(0, std), bias = 0.
# Weight prep (transpose to (in, out) + cast to bf16) is hoisted here, once.
# ----------------------------------------------------------------------------
def init_params(key, std=0.02, compute_dtype=jnp.bfloat16):
    k1, k2, k3 = jax.random.split(key, 3)
    w1_t = std * jax.random.normal(k1, (D_H1, D_IN), jnp.float32)   # torch layout
    w2_t = std * jax.random.normal(k2, (D_H2, D_H1), jnp.float32)
    w3_t = std * jax.random.normal(k3, (D_OUT, D_H2), jnp.float32)
    return {
        "w1": w1_t.T.astype(compute_dtype),
        "b1": jnp.zeros((1, D_H1), jnp.float32),
        "w2": w2_t.T.astype(compute_dtype),
        "b2": jnp.zeros((1, D_H2), jnp.float32),
        "w3": w3_t.T.astype(compute_dtype),
        "b3": jnp.zeros((1, D_OUT), jnp.float32),
    }


def _reference_forward(params, x):
    """Pure-JAX f32 reference (uses the same bf16-rounded weights)."""
    xf = x.reshape(-1, D_IN).astype(jnp.float32)
    h = jnp.maximum(xf @ params["w1"].astype(jnp.float32) + params["b1"], 0.0)
    h = jnp.maximum(h @ params["w2"].astype(jnp.float32) + params["b2"], 0.0)
    o = h @ params["w3"].astype(jnp.float32) + params["b3"]
    return o.reshape(-1, 1, D_OUT)


if __name__ == "__main__":
    root = jax.random.PRNGKey(0)
    k_param, k_x1, k_x2 = jax.random.split(root, 3)

    params = init_params(k_param)
    fwd = jax.jit(generator_fc_forward, static_argnames=("tm_max", "out_dtype"))

    # Primary test: small batch that fits one aligned tile.
    batch = 8
    x1 = jax.random.normal(k_x1, (batch, D_IN), jnp.float32)
    out1 = fwd(params, x1)
    jax.block_until_ready(out1)
    assert out1.shape == (batch, 1, D_OUT)
    assert bool(jnp.all(jnp.isfinite(out1)))
    ref1 = _reference_forward(params, x1)
    assert bool(jnp.allclose(out1, ref1, rtol=0.1, atol=5e-3))

    # Ragged batch: exercises the masked partial last tile (no wrapper pad/slice).
    x2 = jax.random.normal(k_x2, (13, D_IN), jnp.float32)
    out2 = fwd(params, x2)
    jax.block_until_ready(out2)
    assert out2.shape == (13, 1, D_OUT)
    ref2 = _reference_forward(params, x2)
    assert bool(jnp.allclose(out2, ref2, rtol=0.1, atol=5e-3))

    # bf16-output fast path (halves HBM writeback); smoke check only.
    out3 = fwd(params, x1, out_dtype=jnp.bfloat16)
    jax.block_until_ready(out3)
    assert out3.shape == (batch, 1, D_OUT) and out3.dtype == jnp.bfloat16
    assert bool(jnp.all(jnp.isfinite(out3.astype(jnp.float32))))

    print("KERNEL_OK")
</pallas_src>

<mosaic_0001>
module attributes {stable_mosaic.version = 11 : i64} {
  func.func @_generator_fc_kernel(%arg0: i32, %arg1: memref<8x16xbf16, #tpu.memory_space<vmem>>, %arg2: memref<16x64xbf16, #tpu.memory_space<vmem>>, %arg3: memref<1x64xf32, #tpu.memory_space<vmem>>, %arg4: memref<64x256xbf16, #tpu.memory_space<vmem>>, %arg5: memref<1x256xf32, #tpu.memory_space<vmem>>, %arg6: memref<256x1024xbf16, #tpu.memory_space<vmem>>, %arg7: memref<1x1024xf32, #tpu.memory_space<vmem>>, %arg8: memref<8x1024xf32, #tpu.memory_space<vmem>>) attributes {dimension_semantics = [#tpu.dimension_semantics<parallel>], iteration_bounds = array<i64: 1>, scalar_prefetch = 0 : i64, scratch_operands = 0 : i64, tpu.core_type = #tpu.core_type<tc>, window_params = [{transform_indices = @transform_0, window_bounds = array<i64: 8, 16>}, {pipeline_mode = #tpu.pipeline_mode<synchronous>, transform_indices = @transform_1, window_bounds = array<i64: 16, 64>}, {pipeline_mode = #tpu.pipeline_mode<synchronous>, transform_indices = @transform_2, window_bounds = array<i64: 1, 64>}, {pipeline_mode = #tpu.pipeline_mode<synchronous>, transform_indices = @transform_3, window_bounds = array<i64: 64, 256>}, {pipeline_mode = #tpu.pipeline_mode<synchronous>, transform_indices = @transform_4, window_bounds = array<i64: 1, 256>}, {pipeline_mode = #tpu.pipeline_mode<synchronous>, transform_indices = @transform_5, window_bounds = array<i64: 256, 1024>}, {pipeline_mode = #tpu.pipeline_mode<synchronous>, transform_indices = @transform_6, window_bounds = array<i64: 1, 1024>}, {transform_indices = @transform_7, window_bounds = array<i64: 8, 1024>}]} {
    %c0 = arith.constant 0 : index
    %c0_0 = arith.constant 0 : index
    %0 = vector.load %arg1[%c0, %c0_0] : memref<8x16xbf16, #tpu.memory_space<vmem>>, vector<8x16xbf16>
    %c0_1 = arith.constant 0 : index
    %c0_2 = arith.constant 0 : index
    %1 = vector.load %arg2[%c0_1, %c0_2] : memref<16x64xbf16, #tpu.memory_space<vmem>>, vector<16x64xbf16>
    %cst = arith.constant dense<0.000000e+00> : vector<8x64xf32>
    %2 = tpu.matmul %0, %1, %cst {dimension_numbers = #tpu.dot_dimension_numbers<[1], [0], [0], [1], [0, 0, 1, 1], [], []>} : vector<8x16xbf16>, vector<16x64xbf16>, vector<8x64xf32> -> vector<8x64xf32>
    %c0_3 = arith.constant 0 : index
    %c0_4 = arith.constant 0 : index
    %3 = vector.load %arg3[%c0_3, %c0_4] : memref<1x64xf32, #tpu.memory_space<vmem>>, vector<1x64xf32>
    %4 = vector.broadcast %3 : vector<1x64xf32> to vector<8x64xf32>
    %5 = arith.addf %2, %4 : vector<8x64xf32>
    %cst_5 = arith.constant 0.000000e+00 : f32
    %6 = vector.broadcast %cst_5 : f32 to vector<8x64xf32>
    %7 = arith.maximumf %5, %6 : vector<8x64xf32>
    %8 = arith.truncf %7 : vector<8x64xf32> to vector<8x64xbf16>
    %c0_6 = arith.constant 0 : index
    %c0_7 = arith.constant 0 : index
    %9 = vector.load %arg4[%c0_6, %c0_7] : memref<64x256xbf16, #tpu.memory_space<vmem>>, vector<64x256xbf16>
    %cst_8 = arith.constant dense<0.000000e+00> : vector<8x256xf32>
    %10 = tpu.matmul %8, %9, %cst_8 {dimension_numbers = #tpu.dot_dimension_numbers<[1], [0], [0], [1], [0, 0, 1, 1], [], []>} : vector<8x64xbf16>, vector<64x256xbf16>, vector<8x256xf32> -> vector<8x256xf32>
    %c0_9 = arith.constant 0 : index
    %c0_10 = arith.constant 0 : index
    %11 = vector.load %arg5[%c0_9, %c0_10] : memref<1x256xf32, #tpu.memory_space<vmem>>, vector<1x256xf32>
    %12 = vector.broadcast %11 : vector<1x256xf32> to vector<8x256xf32>
    %13 = arith.addf %10, %12 : vector<8x256xf32>
    %cst_11 = arith.constant 0.000000e+00 : f32
    %14 = vector.broadcast %cst_11 : f32 to vector<8x256xf32>
    %15 = arith.maximumf %13, %14 : vector<8x256xf32>
    %16 = arith.truncf %15 : vector<8x256xf32> to vector<8x256xbf16>
    %c0_12 = arith.constant 0 : index
    %c0_13 = arith.constant 0 : index
    %17 = vector.load %arg6[%c0_12, %c0_13] : memref<256x1024xbf16, #tpu.memory_space<vmem>>, vector<256x1024xbf16>
    %cst_14 = arith.constant dense<0.000000e+00> : vector<8x1024xf32>
    %18 = tpu.matmul %16, %17, %cst_14 {dimension_numbers = #tpu.dot_dimension_numbers<[1], [0], [0], [1], [0, 0, 1, 1], [], []>} : vector<8x256xbf16>, vector<256x1024xbf16>, vector<8x1024xf32> -> vector<8x1024xf32>
    %c0_15 = arith.constant 0 : index
    %c0_16 = arith.constant 0 : index
    %19 = vector.load %arg7[%c0_15, %c0_16] : memref<1x1024xf32, #tpu.memory_space<vmem>>, vector<1x1024xf32>
    %20 = vector.broadcast %19 : vector<1x1024xf32> to vector<8x1024xf32>
    %21 = arith.addf %18, %20 : vector<8x1024xf32>
    %c0_17 = arith.constant 0 : index
    %c0_18 = arith.constant 0 : index
    %22 = vector.load %arg8[%c0_17, %c0_18] : memref<8x1024xf32, #tpu.memory_space<vmem>>, vector<8x1024xf32>
    tpu.vector_store %arg8[%c0_17, %c0_18], %21 {strides = array<i32>} : memref<8x1024xf32, #tpu.memory_space<vmem>>, vector<8x1024xf32>,
    return
  }
  func.func @transform_0(%arg0: i32) -> (i32, i32) {
    %c0_i32 = arith.constant 0 : i32
    %c0_i32_0 = arith.constant 0 : i32
    return %arg0, %c0_i32 : i32, i32
  }
  func.func @transform_1(%arg0: i32) -> (i32, i32) {
    %c0_i32 = arith.constant 0 : i32
    %c0_i32_0 = arith.constant 0 : i32
    %c0_i32_1 = arith.constant 0 : i32
    return %c0_i32, %c0_i32_0 : i32, i32
  }
  func.func @transform_2(%arg0: i32) -> (i32, i32) {
    %c0_i32 = arith.constant 0 : i32
    %c0_i32_0 = arith.constant 0 : i32
    %c0_i32_1 = arith.constant 0 : i32
    return %c0_i32, %c0_i32_0 : i32, i32
  }
  func.func @transform_3(%arg0: i32) -> (i32, i32) {
    %c0_i32 = arith.constant 0 : i32
    %c0_i32_0 = arith.constant 0 : i32
    %c0_i32_1 = arith.constant 0 : i32
    return %c0_i32, %c0_i32_0 : i32, i32
  }
  func.func @transform_4(%arg0: i32) -> (i32, i32) {
    %c0_i32 = arith.constant 0 : i32
    %c0_i32_0 = arith.constant 0 : i32
    %c0_i32_1 = arith.constant 0 : i32
    return %c0_i32, %c0_i32_0 : i32, i32
  }
  func.func @transform_5(%arg0: i32) -> (i32, i32) {
    %c0_i32 = arith.constant 0 : i32
    %c0_i32_0 = arith.constant 0 : i32
    %c0_i32_1 = arith.constant 0 : i32
    return %c0_i32, %c0_i32_0 : i32, i32
  }
  func.func @transform_6(%arg0: i32) -> (i32, i32) {
    %c0_i32 = arith.constant 0 : i32
    %c0_i32_0 = arith.constant 0 : i32
    %c0_i32_1 = arith.constant 0 : i32
    return %c0_i32, %c0_i32_0 : i32, i32
  }
  func.func @transform_7(%arg0: i32) -> (i32, i32) {
    %c0_i32 = arith.constant 0 : i32
    %c0_i32_0 = arith.constant 0 : i32
    return %arg0, %c0_i32 : i32, i32
  }
}

</mosaic_0001>

<bundles_post_ra>
// kernel: generator_fc_forward.1
= control target key start
LH: loop header
LB: loop body
LE: loop exit
PB: predicated region body
PF: predicated region fallthrough
CT: control target
= control target key end

     0   :  { %12 = vsyncpa [#allocation3], 0  ;;  %s1590_s0 = inlined_call_operand.vmem [shape: bf16[8,16], index: 0, kind: input, shape index: {}]   ;;  %s1591_s1 = inlined_call_operand.vmem [shape: bf16[16,64], index: 1, kind: input, shape index: {}]   ;;  %s1592_s2 = inlined_call_operand.vmem [shape: f32[1,64], index: 2, kind: input, shape index: {}]   ;;  %s1593_s3 = inlined_call_operand.hbm [shape: bf16[64,256], index: 3, kind: input, shape index: {}]   ;;  %s1594_s4 = inlined_call_operand.vmem [shape: f32[1,256], index: 4, kind: input, shape index: {}]   ;;  %s1595_s5 = inlined_call_operand.hbm [shape: bf16[256,1024], index: 5, kind: input, shape index: {}]   ;;  %s1596_s6 = inlined_call_operand.hbm [shape: f32[1,1024], index: 6, kind: input, shape index: {}]   ;;  %s1597_s7 = inlined_call_operand.vmem [shape: f32[8,1024], index: 7, kind: output, shape index: {}]  }
   0x1   :  { %13 = vsyncpa [#allocation5], 0  ;;  %s1460_s24 = smov [#allocation4]  }
   0x2   :  { %s39_s25 = sshll.u32 %s1460_s24, 4  ;;  %s40_s25 = int_to_ptr.vmem [resolvable:$true] %s39_s25 }
   0x3   :  { %s1404_s26 = scalar_lea.vmem %s40_s25, 16384  ;;  %p1409_p1 = scmp.lt.s32.totalorder %s40_s25, %s40_s25 }
   0x4   :  { %p1405_p0 = scmp.ne.s32.totalorder %s40_s25, %s1404_s26  ;;  %p1410_p2 = scmp.lt.s32.totalorder %s1404_s26, %s1404_s26 }
   0x6   :  { %p1411_p3 = por %p1410_p2, %p1409_p1 }
   0x8   :  { %p1412_p4 = pnand %p1411_p3, %p1405_p0 }
   0xa   :  { %1415 = shalt.err (!%p1412_p4)
}
   0xb   :  { %s1461_s27 = smov 512   ;;  %s1462_s28 = smov 32  }
   0xc   :  { %45 = dma.hbm_to_vmem [thread:$0]  %s1595_s5, 16384, %s40_s25, [#allocation5], %s1461_s27, %s1461_s27, %s1462_s28  }
   0xd   :  { %s1463_s8 = smov [#allocation2]  }
   0xe   :  { %s25_s9 = sshll.u32 %s1463_s8, 4  ;;  %s26_s9 = int_to_ptr.vmem [resolvable:$true] %s25_s9 }
   0xf   :  { %s1424_s10 = scalar_lea.vmem %s26_s9, 1024  ;;  %p1429_p6 = scmp.lt.s32.totalorder %s26_s9, %s26_s9 }
  0x10   :  { %p1425_p5 = scmp.ne.s32.totalorder %s26_s9, %s1424_s10  ;;  %p1430_p7 = scmp.lt.s32.totalorder %s1424_s10, %s1424_s10 }
  0x12   :  { %p1431_p8 = por %p1430_p7, %p1429_p6 }
  0x14   :  { %p1432_p9 = pnand %p1431_p8, %p1425_p5 }
  0x16   :  { %1435 = shalt.err (!%p1432_p9)
}
  0x17   :  { %s1464_s11 = smov 128   ;;  %s1465_s12 = smov 8  }
  0x18   :  { %31 = dma.hbm_to_vmem [thread:$0]  %s1593_s3, 1024, %s26_s9, [#allocation3], %s1464_s11, %s1464_s11, %s1465_s12  }
  0x19   :  { %s1466_s15 = smov [#allocation6]  }
  0x1a   :  { %s52_s16 = sshll.u32 %s1466_s15, 4  ;;  %s53_s16 = int_to_ptr.vmem [resolvable:$true] %s52_s16 }
  0x1b   :  { %s1444_s5 = scalar_lea.vmem %s53_s16, 128  ;;  %p1449_p11 = scmp.lt.s32.totalorder %s53_s16, %s53_s16 }
  0x1c   :  { %p1445_p10 = scmp.ne.s32.totalorder %s53_s16, %s1444_s5  ;;  %p1450_p12 = scmp.lt.s32.totalorder %s1444_s5, %s1444_s5 }
  0x1e   :  { %p1451_p13 = por %p1450_p12, %p1449_p11 }
  0x20   :  { %p1452_p0 = pnand %p1451_p13, %p1445_p10 }
  0x22   :  { %1455 = shalt.err (!%p1452_p0)
}
  0x23   :  { %55 = dma.hbm_to_vmem [thread:$0]  %s1596_s6, 128, %s53_s16, [#allocation5]  }
  0x24   :  { %1456 = dma.done.wait [#allocation3], 1024  }
  0x25   :  { %1457 = vsyncadd [#allocation3], 4294966272 }
  0x26   :  { %1458 = dma.done.wait [#allocation5], 16512  }
  0x27   :  { %1459 = vsyncadd [#allocation5], 4294950784  ;;  %v1467_v0 = vmov 0.0   ;;  %vm1468_vm0 = vmmov 0   ;;  %v1383_v1 = vld [vmem:[%s1591_s1] sm:$0xff]   ;;  %vm82_vm1 = vcmask 130048  }
  0x28   :  { %1367 = vmatprep.subr.bf16.mxu0 %v1467_v0  ;;  %1369 = vmatprep.mubr.msk.bf16.mxu0 %vm1468_vm0, %v1467_v0  ;;  %v66_v2 = vld [vmem:[%s1590_s0] sm:$0xf]  ;;  %v1384_v3 = vld [vmem:[#allocation2 + $0x34] ss:$8 sps:$4 sm:$0xff]   ;;  %v1386_v4 = vld [vmem:[#allocation2 + $0x30] ss:$8 sps:$4 sm:$0xff]  }
  0x29   :  { %1368 = vmatpush3.bf16.msra.mxu0 %v1383_v1  ;;  %v1387_v5 = vld [vmem:[#allocation2 + $0x24] ss:$8 sps:$4 sm:$0xff]   ;;  %200 = vmatprep.subr.bf16.mxu1 %v1384_v3  ;;  %v1389_v6 = vld [vmem:[#allocation2 + $0x20] ss:$8 sps:$4 sm:$0xff]   ;;  %v1390_v7 = vld [vmem:[#allocation2 + $0x14] ss:$8 sps:$4 sm:$0xff]  }
  0x2a   :  { %201 = vmatpush1.bf16.msra.mxu1 %v1386_v4  ;;  %v1392_v8 = vld [vmem:[#allocation2 + $0x10] ss:$8 sps:$4 sm:$0xff]   ;;  %v1393_v9 = vld [vmem:[#allocation2 + $0x4] ss:$8 sps:$4 sm:$0xff]   ;;  %v1395_v10 = vld [vmem:[#allocation2] ss:$8 sps:$4 sm:$0xff]  }
  0x2b   :  { %202 = vmatprep.subr.bf16.mxu1 %v1387_v5  ;;  %v1469_v11 = vmov 0   ;;  %v293_v12 = vld [vmem:[#allocation4 + $0x1c0] sm:$0xff]  ;;  %v1525_v14 = vld [vmem:[#allocation4 + $0x1c8] sm:$0xff]  ;;  %vm188_vm2 = vcmask 523264  }
  0x2c   :  { %1370 = vmatmul.mubr.msk.bf16.vlgmr.msra.gmra.mxu0 %vm82_vm1, %v66_v2  ;;  %224 = vmatprep.mubr.bf16.mxu1 %v1469_v11  ;;  %v297_v13 = vld [vmem:[#allocation4 + $0x1e0] sm:$0xff]  ;;  %v1527_v17 = vld [vmem:[#allocation4 + $0x1e8] sm:$0xff] }
  0x2d   :  { %v1293_v15 = vcombine.low %v293_v12, %v297_v13  ;;  %v1294_v16 = vcombine.high %v293_v12, %v297_v13  ;;  %v285_v18 = vld [vmem:[#allocation4 + $0x180] sm:$0xff]  ;;  %v1295_v20 = vcombine.low %v1525_v14, %v1527_v17  ;;  %v1296_v21 = vcombine.high %v1525_v14, %v1527_v17  ;;  %v286_v12 = vld [vmem:[#allocation4 + $0x188] sm:$0xff] }
  0x2e   :  { %203 = vmatpush1.bf16.msra.mxu1 %v1389_v6  ;;  %v289_v19 = vld [vmem:[#allocation4 + $0x1a0] sm:$0xff]  ;;  %v290_v13 = vld [vmem:[#allocation4 + $0x1a8] sm:$0xff] }
  0x2f   :  { %204 = vmatprep.subr.bf16.mxu1 %v1390_v7  ;;  %v1286_v22 = vcombine.high %v285_v18, %v289_v19  ;;  %1047 = vmatprep.subr.bf16.mxu0 %v1294_v16  ;;  %v1285_v23 = vcombine.low %v285_v18, %v289_v19  ;;  %v277_v24 = vld [vmem:[#allocation4 + $0x140] sm:$0xff]  ;;  %v1288_v19 = vcombine.high %v286_v12, %v290_v13 }
  0x30   :  { %1048 = vmatpush1.bf16.msra.mxu0 %v1293_v15  ;;  %v281_v25 = vld [vmem:[#allocation4 + $0x160] sm:$0xff] }
  0x31   :  { %1049 = vmatprep.subr.bf16.mxu0 %v1286_v22  ;;  %v1278_v26 = vcombine.high %v277_v24, %v281_v25  ;;  %v1277_v27 = vcombine.low %v277_v24, %v281_v25  ;;  %v269_v28 = vld [vmem:[#allocation4 + $0x100] sm:$0xff]  ;;  %v278_v22 = vld [vmem:[#allocation4 + $0x148] sm:$0xff]  ;;  %v1287_v24 = vcombine.low %v286_v12, %v290_v13 }
  0x32   :  { %205 = vmatpush1.bf16.msra.mxu1 %v1392_v8  ;;  %v273_v29 = vld [vmem:[#allocation4 + $0x120] sm:$0xff] }
  0x33   :  { %206 = vmatprep.subr.bf16.mxu1 %v1393_v9  ;;  %v1270_v30 = vcombine.high %v269_v28, %v273_v29  ;;  %v1269_v31 = vcombine.low %v269_v28, %v273_v29  ;;  %v261_v32 = vld [vmem:[#allocation4 + $0xc0] sm:$0xff] }
  0x34   :  { %1050 = vmatpush1.bf16.msra.mxu0 %v1285_v23  ;;  %v265_v33 = vld [vmem:[#allocation4 + $0xe0] sm:$0xff]  ;;  %v282_v23 = vld [vmem:[#allocation4 + $0x168] sm:$0xff] }
  0x35   :  { %1051 = vmatprep.subr.bf16.mxu0 %v1278_v26  ;;  %v1262_v34 = vcombine.high %v261_v32, %v265_v33  ;;  %v1261_v35 = vcombine.low %v261_v32, %v265_v33  ;;  %v253_v36 = vld [vmem:[#allocation4 + $0x80] sm:$0xff]  ;;  %v1280_v25 = vcombine.high %v278_v22, %v282_v23  ;;  %v270_v26 = vld [vmem:[#allocation4 + $0x108] sm:$0xff]  ;;  %v1279_v28 = vcombine.low %v278_v22, %v282_v23  ;;  %v295_v23 = vld [vmem:[#allocation4 + $0x1d0] sm:$0xff] }
  0x36   :  { %207 = vmatpush1.bf16.msra.mxu1 %v1395_v10  ;;  %v257_v37 = vld [vmem:[#allocation4 + $0xa0] sm:$0xff] }
  0x37   :  { %1088 = vmatprep.subr.bf16.mxu1 %v1296_v21  ;;  %v1254_v38 = vcombine.high %v253_v36, %v257_v37  ;;  %v1253_v39 = vcombine.low %v253_v36, %v257_v37  ;;  %v245_v40 = vld [vmem:[#allocation4 + $0x40] sm:$0xff]  ;;  %v250_v36 = vld [vmem:[#allocation4 + $0x68] sm:$0xff] }
  0x38   :  { %1052 = vmatpush1.bf16.msra.mxu0 %v1277_v27  ;;  %v249_v41 = vld [vmem:[#allocation4 + $0x60] sm:$0xff]  ;;  %v274_v27 = vld [vmem:[#allocation4 + $0x128] sm:$0xff] }
  0x39   :  { %1053 = vmatprep.subr.bf16.mxu0 %v1270_v30  ;;  %v1246_v42 = vcombine.high %v245_v40, %v249_v41  ;;  %v1245_v43 = vcombine.low %v245_v40, %v249_v41  ;;  %v237_v44 = vld [vmem:[#allocation4] sm:$0xff]  ;;  %v1272_v29 = vcombine.high %v270_v26, %v274_v27  ;;  %v262_v30 = vld [vmem:[#allocation4 + $0xc8] sm:$0xff]  ;;  %v1271_v32 = vcombine.low %v270_v26, %v274_v27  ;;  %v300_v27 = vld [vmem:[#allocation4 + $0x1f8] sm:$0xff] }
  0x3a   :  { %v241_v45 = vld [vmem:[#allocation4 + $0x20] sm:$0xff]  ;;  %v242_v40 = vld [vmem:[#allocation4 + $0x28] sm:$0xff] }
  0x3b   :  { %v1238_v46 = vcombine.high %v237_v44, %v241_v45  ;;  %v1237_v47 = vcombine.low %v237_v44, %v241_v45  ;;  %v357_v48 = vld [vmem:[#allocation4 + $0x3c0] sm:$0xff]  ;;  %v362_v44 = vld [vmem:[#allocation4 + $0x3e8] sm:$0xff] }
  0x3c   :  { %1054 = vmatpush1.bf16.msra.mxu0 %v1269_v31  ;;  %v361_v49 = vld [vmem:[#allocation4 + $0x3e0] sm:$0xff]  ;;  %v266_v31 = vld [vmem:[#allocation4 + $0xe8] sm:$0xff] }
  0x3d   :  { %1055 = vmatprep.subr.bf16.mxu0 %v1262_v34  ;;  %v1358_v50 = vcombine.high %v357_v48, %v361_v49  ;;  %v1357_v51 = vcombine.low %v357_v48, %v361_v49  ;;  %v349_v52 = vld [vmem:[#allocation4 + $0x380] sm:$0xff]  ;;  %v1264_v33 = vcombine.high %v262_v30, %v266_v31  ;;  %v254_v34 = vld [vmem:[#allocation4 + $0x88] sm:$0xff]  ;;  %v1263_v14 = vcombine.low %v262_v30, %v266_v31 }
  0x3e   :  { %v353_v53 = vld [vmem:[#allocation4 + $0x3a0] sm:$0xff]  ;;  %v354_v48 = vld [vmem:[#allocation4 + $0x3a8] sm:$0xff]  ;;  %v138_v31 = vlaneseq }
  0x3f   :  { %v1350_v54 = vcombine.high %v349_v52, %v353_v53  ;;  %v1349_v55 = vcombine.low %v349_v52, %v353_v53  ;;  %v341_v56 = vld [vmem:[#allocation4 + $0x340] sm:$0xff]  ;;  %v346_v52 = vld [vmem:[#allocation4 + $0x368] sm:$0xff] }
  0x40   :  { %1056 = vmatpush1.bf16.msra.mxu0 %v1261_v35  ;;  %v345_v57 = vld [vmem:[#allocation4 + $0x360] sm:$0xff]  ;;  %v258_v35 = vld [vmem:[#allocation4 + $0xa8] sm:$0xff] }
  0x41   :  { %1057 = vmatprep.subr.bf16.mxu0 %v1254_v38  ;;  %v1342_v58 = vcombine.high %v341_v56, %v345_v57  ;;  %v1341_v59 = vcombine.low %v341_v56, %v345_v57  ;;  %v333_v60 = vld [vmem:[#allocation4 + $0x300] sm:$0xff]  ;;  %v1256_v17 = vcombine.high %v254_v34, %v258_v35  ;;  %v1255_v37 = vcombine.low %v254_v34, %v258_v35  ;;  %v338_v56 = vld [vmem:[#allocation4 + $0x328] sm:$0xff] }
  0x42   :  { %v337_v61 = vld [vmem:[#allocation4 + $0x320] sm:$0xff] }
  0x43   :  { %v1334_v62 = vcombine.high %v333_v60, %v337_v61  ;;  %v1333_v63 = vcombine.low %v333_v60, %v337_v61  ;;  %v325_v0 = vld [vmem:[#allocation4 + $0x2c0] sm:$0xff]  ;;  %v330_v60 = vld [vmem:[#allocation4 + $0x2e8] sm:$0xff] }
  0x44   :  { %1058 = vmatpush1.bf16.msra.mxu0 %v1253_v39  ;;  %v329_v1 = vld [vmem:[#allocation4 + $0x2e0] sm:$0xff]  ;;  %v238_v39 = vld [vmem:[#allocation4 + $0x8] sm:$0xff] }
  0x45   :  { %1059 = vmatprep.subr.bf16.mxu0 %v1246_v42  ;;  %v1326_v2 = vcombine.high %v325_v0, %v329_v1  ;;  %v1325_v3 = vcombine.low %v325_v0, %v329_v1  ;;  %v317_v4 = vld [vmem:[#allocation4 + $0x280] sm:$0xff]  ;;  %v1240_v42 = vcombine.high %v238_v39, %v242_v40  ;;  %v1239_v45 = vcombine.low %v238_v39, %v242_v40  ;;  %v322_v0 = vld [vmem:[#allocation4 + $0x2a8] sm:$0xff] }
  0x46   :  { %v321_v5 = vld [vmem:[#allocation4 + $0x2a0] sm:$0xff] }
  0x47   :  { %v1318_v6 = vcombine.high %v317_v4, %v321_v5  ;;  %v1317_v7 = vcombine.low %v317_v4, %v321_v5  ;;  %v1225_v8 = vld [vmem:[%s1592_s2] ss:$0 sm:$0xff] }
  0x48   :  { %1060 = vmatpush1.bf16.msra.mxu0 %v1245_v43  ;;  %v358_v43 = vld [vmem:[#allocation4 + $0x3c8] sm:$0xff]  ;;  %v309_v4 = vld [vmem:[#allocation4 + $0x240] sm:$0xff] }
  0x49   :  { %1061 = vmatprep.subr.bf16.mxu0 %v1238_v46  ;;  %v1360_v46 = vcombine.high %v358_v43, %v362_v44  ;;  %v1359_v49 = vcombine.low %v358_v43, %v362_v44  ;;  %v313_v5 = vld [vmem:[#allocation4 + $0x260] sm:$0xff]  ;;  %v291_v44 = vld [vmem:[#allocation4 + $0x1b0] sm:$0xff] }
  0x4a   :  { %v301_v12 = vld [vmem:[#allocation4 + $0x200] sm:$0xff] }
  0x4b   :  { %v305_v13 = vld [vmem:[#allocation4 + $0x220] sm:$0xff] }
  0x4c   :  { %1062 = vmatpush1.bf16.msra.mxu0 %v1237_v47  ;;  %v350_v47 = vld [vmem:[#allocation4 + $0x388] sm:$0xff]  ;;  %v136_v34 = vld [vmem:[%s1594_s4] sm:$0x3] }
  0x4d   :  { %1063 = vmatprep.subr.bf16.mxu0 %v1358_v50  ;;  %v1352_v50 = vcombine.high %v350_v47, %v354_v48  ;;  %v1351_v53 = vcombine.low %v350_v47, %v354_v48 }
  0x50   :  { %1064 = vmatpush2.bf16.msra.mxu0 %v1357_v51  ;;  %v342_v51 = vld [vmem:[#allocation4 + $0x348] sm:$0xff] }
  0x51   :  { %1065 = vmatprep.subr.bf16.mxu0 %v1350_v54  ;;  %v1344_v54 = vcombine.high %v342_v51, %v346_v52  ;;  %v1343_v57 = vcombine.low %v342_v51, %v346_v52  ;;  %v283_v52 = vld [vmem:[#allocation4 + $0x170] sm:$0xff] }
  0x54   :  { %1066 = vmatpush2.bf16.msra.mxu0 %v1349_v55  ;;  %v334_v55 = vld [vmem:[#allocation4 + $0x308] sm:$0xff] }
  0x55   :  { %1067 = vmatprep.subr.bf16.mxu0 %v1342_v58  ;;  %v1336_v58 = vcombine.high %v334_v55, %v338_v56  ;;  %v1335_v61 = vcombine.low %v334_v55, %v338_v56 }
  0x58   :  { %1068 = vmatpush2.bf16.msra.mxu0 %v1341_v59  ;;  %v326_v59 = vld [vmem:[#allocation4 + $0x2c8] sm:$0xff] }
  0x59   :  { %1069 = vmatprep.subr.bf16.mxu0 %v1334_v62  ;;  %v1328_v62 = vcombine.high %v326_v59, %v330_v60  ;;  %v1327_v1 = vcombine.low %v326_v59, %v330_v60  ;;  %v271_v59 = vld [vmem:[#allocation4 + $0x110] sm:$0xff] }
  0x5a   :  { %v275_v60 = vld [vmem:[#allocation4 + $0x130] sm:$0xff] }
  0x5c   :  { %1070 = vmatpush2.bf16.msra.mxu0 %v1333_v63  ;;  %v318_v63 = vld [vmem:[#allocation4 + $0x288] sm:$0xff] }
  0x5d   :  { %1071 = vmatprep.subr.bf16.mxu0 %v1326_v2  ;;  %v1320_v2 = vcombine.high %v318_v63, %v322_v0 }
  0x60   :  { %1072 = vmatpush2.bf16.msra.mxu0 %v1325_v3  ;;  %v1319_v3 = vcombine.low %v318_v63, %v322_v0 }
  0x61   :  { %1073 = vmatprep.subr.bf16.mxu0 %v1318_v6  ;;  %v310_v6 = vld [vmem:[#allocation4 + $0x248] sm:$0xff] }
  0x64   :  { %1074 = vmatpush2.bf16.msra.mxu0 %v1317_v7  ;;  %v1310_v7 = vcombine.high %v309_v4, %v313_v5 }
  0x66   :  { %1075 = vmatprep.subr.bf16.mxu0 %v1310_v7  ;;  %v1273_v7 = vcombine.low %v271_v59, %v275_v60 }
  0xec   :  { %v120_v9 = vpop.f32.mrf.mxu0 }
  0xed   :  { %v121_v10 = vadd.f32 %v1225_v8, %v120_v9  ;;  %v314_v8 = vld [vmem:[#allocation4 + $0x268] sm:$0xff]  ;;  %v1309_v9 = vcombine.low %v309_v4, %v313_v5  ;;  %v267_v4 = vld [vmem:[#allocation4 + $0xf0] sm:$0xff]  ;;  %v264_v5 = vld [vmem:[#allocation4 + $0xd8] sm:$0xff] }
  0xee   :  { %v1371_v11 = vpop.f32.mrf.mxu0 }
  0xef   :  { %v126_v15 = vmax.f32 %v121_v10, 0.0  ;;  %v1311_v10 = vcombine.low %v310_v6, %v314_v8  ;;  %v1312_v11 = vcombine.high %v310_v6, %v314_v8  ;;  %1076 = vmatpush2.bf16.msra.mxu0 %v1309_v9  ;;  %v268_v6 = vld [vmem:[#allocation4 + $0xf8] sm:$0xff] }
  0xf0   :  { %v123_v16 = vpop.f32.mrf.mxu0 }
  0xf1   :  { %v127_v18 = vpack.c.bf16 %v126_v15, %v126_v15  ;;  %v302_v15 = vld [vmem:[#allocation4 + $0x208] sm:$0xff]  ;;  %v1302_v16 = vcombine.high %v301_v12, %v305_v13 }
  0xf2   :  { %v1372_v21 = vpop.f32.mrf.mxu0 }
  0xf3   :  { %1236 = vmatmul.mubr.msk.bf16.vlgmr.msra.gmra.mxu1 %vm188_vm2, %v127_v18  ;;  %v306_v18 = vld [vmem:[#allocation4 + $0x228] sm:$0xff]  ;;  %1077 = vmatprep.subr.bf16.mxu0 %v1302_v16 }
  0xf4   :  { %1089 = vmatpush1.bf16.msra.mxu1 %v1295_v20  ;;  %v246_v20 = vld [vmem:[#allocation4 + $0x48] sm:$0xff]  ;;  %v1303_v21 = vcombine.low %v302_v15, %v306_v18  ;;  %v1304_v22 = vcombine.high %v302_v15, %v306_v18  ;;  %v260_v15 = vld [vmem:[#allocation4 + $0xb8] sm:$0xff]  ;;  %v1267_v18 = vcombine.low %v264_v5, %v268_v6 }
  0xf5   :  { %1090 = vmatprep.subr.bf16.mxu1 %v1288_v19  ;;  %v1248_v38 = vcombine.high %v246_v20, %v250_v36  ;;  %v1247_v41 = vcombine.low %v246_v20, %v250_v36  ;;  %v1301_v19 = vcombine.low %v301_v12, %v305_v13  ;;  %v259_v12 = vld [vmem:[#allocation4 + $0xb0] sm:$0xff]  ;;  %v256_v13 = vld [vmem:[#allocation4 + $0x98] sm:$0xff] }
  0xf7   :  { %1078 = vmatpush2.bf16.msra.mxu0 %v1301_v19 }
  0xf8   :  { %1091 = vmatpush1.bf16.msra.mxu1 %v1287_v24  ;;  %v299_v24 = vld [vmem:[#allocation4 + $0x1f0] sm:$0xff] }
  0xf9   :  { %1092 = vmatprep.subr.bf16.mxu1 %v1280_v25  ;;  %v296_v25 = vld [vmem:[#allocation4 + $0x1d8] sm:$0xff]  ;;  %v1298_v26 = vcombine.high %v295_v23, %v299_v24 }
  0xfa   :  { %v1300_v30 = vcombine.high %v296_v25, %v300_v27 }
  0xfb   :  { %1129 = vmatprep.subr.bf16.mxu0 %v1298_v26 }
  0xfc   :  { %1093 = vmatpush1.bf16.msra.mxu1 %v1279_v28  ;;  %v1297_v28 = vcombine.low %v295_v23, %v299_v24  ;;  %v251_v23 = vld [vmem:[#allocation4 + $0x70] sm:$0xff]  ;;  %v248_v24 = vld [vmem:[#allocation4 + $0x58] sm:$0xff] }
  0xfd   :  { %1094 = vmatprep.subr.bf16.mxu1 %v1272_v29  ;;  %v1299_v29 = vcombine.low %v296_v25, %v300_v27  ;;  %v252_v25 = vld [vmem:[#allocation4 + $0x78] sm:$0xff]  ;;  %v1259_v27 = vcombine.low %v256_v13, %v260_v15 }
 0x100   :  { %1095 = vmatpush1.bf16.msra.mxu1 %v1271_v32  ;;  %v1539_v32 = vshrl.u32 %v138_v31, 7  ;;  %v243_v31 = vld [vmem:[#allocation4 + $0x30] sm:$0xff] }
 0x101   :  { %1096 = vmatprep.subr.bf16.mxu1 %v1264_v33 }
 0x102   :  { %v140_v33 = vsub.s32 0, %v1539_v32  ;;  %v144_v35 = vsub.s32 1, %v1539_v32 }
 0x104   :  { %1097 = vmatpush1.bf16.msra.mxu1 %v1263_v14  ;;  %v141_v14 = vrot.slane %v136_v34, %v140_v33 }
 0x105   :  { %1098 = vmatprep.subr.bf16.mxu1 %v1256_v17  ;;  %v145_v17 = vrot.slane %v136_v34, %v144_v35  ;;  %v240_v34 = vld [vmem:[#allocation4 + $0x18] sm:$0xff] }
 0x108   :  { %1099 = vmatpush1.bf16.msra.mxu1 %v1255_v37 }
 0x109   :  { %1100 = vmatprep.subr.bf16.mxu1 %v1248_v38 }
 0x10c   :  { %1101 = vmatpush1.bf16.msra.mxu1 %v1247_v41 }
 0x10d   :  { %1102 = vmatprep.subr.bf16.mxu1 %v1240_v42  ;;  %v287_v42 = vld [vmem:[#allocation4 + $0x190] sm:$0xff] }
 0x10e   :  { %v1289_v55 = vcombine.low %v287_v42, %v291_v44 }
 0x110   :  { %1103 = vmatpush1.bf16.msra.mxu1 %v1239_v45  ;;  %v288_v45 = vld [vmem:[#allocation4 + $0x198] sm:$0xff] }
 0x111   :  { %1104 = vmatprep.subr.bf16.mxu1 %v1360_v46  ;;  %v292_v46 = vld [vmem:[#allocation4 + $0x1b8] sm:$0xff] }
 0x112   :  { %v1292_v51 = vcombine.high %v288_v45, %v292_v46  ;;  %v1291_v56 = vcombine.low %v288_v45, %v292_v46  ;;  %v351_v46 = vld [vmem:[#allocation4 + $0x390] sm:$0xff] }
 0x114   :  { %1105 = vmatpush2.bf16.msra.mxu1 %v1359_v49  ;;  %v279_v49 = vld [vmem:[#allocation4 + $0x150] sm:$0xff] }
 0x115   :  { %1106 = vmatprep.subr.bf16.mxu1 %v1352_v50  ;;  %v1290_v50 = vcombine.high %v287_v42, %v291_v44  ;;  %v1281_v63 = vcombine.low %v279_v49, %v283_v52 }
 0x118   :  { %1107 = vmatpush2.bf16.msra.mxu1 %v1351_v53  ;;  %v280_v53 = vld [vmem:[#allocation4 + $0x158] sm:$0xff] }
 0x119   :  { %1108 = vmatprep.subr.bf16.mxu1 %v1344_v54  ;;  %v284_v54 = vld [vmem:[#allocation4 + $0x178] sm:$0xff] }
 0x11a   :  { %v1283_v0 = vcombine.low %v280_v53, %v284_v54 }
 0x11c   :  { %1109 = vmatpush2.bf16.msra.mxu1 %v1343_v57  ;;  %v1282_v57 = vcombine.high %v279_v49, %v283_v52  ;;  %v352_v49 = vld [vmem:[#allocation4 + $0x398] sm:$0xff] }
 0x11d   :  { %1110 = vmatprep.subr.bf16.mxu1 %v1336_v58  ;;  %v1284_v58 = vcombine.high %v280_v53, %v284_v54 }
 0x120   :  { %1111 = vmatpush2.bf16.msra.mxu1 %v1335_v61  ;;  %v272_v61 = vld [vmem:[#allocation4 + $0x118] sm:$0xff] }
 0x121   :  { %1112 = vmatprep.subr.bf16.mxu1 %v1328_v62  ;;  %v276_v62 = vld [vmem:[#allocation4 + $0x138] sm:$0xff] }
 0x122   :  { %v1275_v8 = vcombine.low %v272_v61, %v276_v62 }
 0x124   :  { %1113 = vmatpush2.bf16.msra.mxu1 %v1327_v1  ;;  %v1274_v1 = vcombine.high %v271_v59, %v275_v60 }
 0x125   :  { %1114 = vmatprep.subr.bf16.mxu1 %v1320_v2  ;;  %v1276_v2 = vcombine.high %v272_v61, %v276_v62 }
 0x128   :  { %1115 = vmatpush2.bf16.msra.mxu1 %v1319_v3  ;;  %v263_v3 = vld [vmem:[#allocation4 + $0xd0] sm:$0xff] }
 0x129   :  { %1116 = vmatprep.subr.bf16.mxu1 %v1312_v11  ;;  %v1266_v9 = vcombine.high %v263_v3, %v267_v4  ;;  %v255_v11 = vld [vmem:[#allocation4 + $0x90] sm:$0xff]  ;;  %v1265_v16 = vcombine.low %v263_v3, %v267_v4 }
 0x12a   :  { %v1258_v19 = vcombine.high %v255_v11, %v259_v12  ;;  %v1257_v26 = vcombine.low %v255_v11, %v259_v12 }
 0x12c   :  { %1117 = vmatpush2.bf16.msra.mxu1 %v1311_v10  ;;  %v1268_v10 = vcombine.high %v264_v5, %v268_v6 }
 0x12d   :  { %1118 = vmatprep.subr.bf16.mxu1 %v1304_v22  ;;  %v247_v22 = vld [vmem:[#allocation4 + $0x50] sm:$0xff] }
 0x130   :  { %1119 = vmatpush2.bf16.msra.mxu1 %v1303_v21  ;;  %v1260_v21 = vcombine.high %v256_v13, %v260_v15 }
 0x131   :  { %1170 = vmatprep.subr.bf16.mxu1 %v1300_v30  ;;  %v239_v30 = vld [vmem:[#allocation4 + $0x10] sm:$0xff] }
 0x132   :  { %v1241_v42 = vcombine.low %v239_v30, %v243_v31 }
 0x1b3   :  { %v226_v20 = vpop.f32.mrf.mxu1 }
 0x1b4   :  { %v227_v36 = vadd.f32 %v226_v20, %v141_v14  ;;  %v244_v14 = vld [vmem:[#allocation4 + $0x38] sm:$0xff]  ;;  %v1251_v20 = vcombine.low %v248_v24, %v252_v25 }
 0x1b5   :  { %v228_v37 = vpop.f32.mrf.mxu1 }
 0x1b6   :  { %v229_v38 = vadd.f32 %v228_v37, %v145_v17  ;;  %v233_v39 = vmax.f32 %v227_v36, 0.0  ;;  %v1249_v17 = vcombine.low %v247_v22, %v251_v23  ;;  %v1242_v36 = vcombine.high %v239_v30, %v243_v31 }
 0x1b7   :  { %v230_v40 = vpop.f32.mrf.mxu1  ;;  %v1244_v37 = vcombine.high %v240_v34, %v244_v14 }
 0x1b8   :  { %v234_v41 = vmax.f32 %v229_v38, 0.0  ;;  %v1550_v48 = vpack.c.bf16 %v233_v39, %v233_v39  ;;  %v359_v38 = vld [vmem:[#allocation4 + $0x3d0] sm:$0xff]  ;;  %v360_v40 = vld [vmem:[#allocation4 + $0x3d8] sm:$0xff] }
 0x1b9   :  { %v231_v43 = vpop.f32.mrf.mxu1  ;;  %v363_v39 = vld [vmem:[#allocation4 + $0x3f0] sm:$0xff] }
 0x1ba   :  { %v236_v47 = vpack.c.bf16 %v234_v41, %v234_v41  ;;  %v364_v41 = vld [vmem:[#allocation4 + $0x3f8] sm:$0xff]  ;;  %v1243_v43 = vcombine.low %v240_v34, %v244_v14  ;;  %v1362_v44 = vcombine.high %v359_v38, %v363_v39 }
 0x1bb   :  { %v1364_v45 = vcombine.high %v360_v40, %v364_v41  ;;  %v1363_v52 = vcombine.low %v360_v40, %v364_v41 }
 0x1bc   :  { %1079 = vmatprep.mubr.bf16.mxu0 %v236_v47  ;;  %1120 = vmatprep.mubr.bf16.mxu1 %v236_v47 }
 0x1bd   :  { %1080 = vmatmul.mubr.bf16.vlgmr.msra.gmra.mxu0 %v1550_v48  ;;  %1121 = vmatmul.mubr.bf16.vlgmr.msra.gmra.mxu1 %v1550_v48 }
 0x1be   :  { %1130 = vmatpush1.bf16.msra.mxu0 %v1297_v28  ;;  %1171 = vmatpush1.bf16.msra.mxu1 %v1299_v29  ;;  %v1250_v28 = vcombine.high %v247_v22, %v251_v23  ;;  %v1252_v29 = vcombine.high %v248_v24, %v252_v25 }
 0x1bf   :  { %1161 = vmatprep.mubr.bf16.mxu0 %v236_v47  ;;  %1202 = vmatprep.mubr.bf16.mxu1 %v236_v47  ;;  %v355_v47 = vld [vmem:[#allocation4 + $0x3b0] sm:$0xff] }
 0x1c0   :  { %1131 = vmatprep.subr.bf16.mxu0 %v1290_v50  ;;  %1172 = vmatprep.subr.bf16.mxu1 %v1292_v51  ;;  %v356_v50 = vld [vmem:[#allocation4 + $0x3b8] sm:$0xff]  ;;  %v1361_v51 = vcombine.low %v359_v38, %v363_v39  ;;  %v1354_v53 = vcombine.high %v351_v46, %v355_v47  ;;  %v1353_v59 = vcombine.low %v351_v46, %v355_v47  ;;  %v381_v46 = vsub.s32 3, %v1539_v32 }
 0x1c1   :  { %v1356_v54 = vcombine.high %v352_v49, %v356_v50  ;;  %v1355_v60 = vcombine.low %v352_v49, %v356_v50 }
 0x1c2   :  { %1132 = vmatpush1.bf16.msra.mxu0 %v1289_v55  ;;  %1173 = vmatpush1.bf16.msra.mxu1 %v1291_v56  ;;  %v343_v55 = vld [vmem:[#allocation4 + $0x350] sm:$0xff] }
 0x1c3   :  { %1133 = vmatprep.subr.bf16.mxu0 %v1282_v57  ;;  %1174 = vmatprep.subr.bf16.mxu1 %v1284_v58  ;;  %v347_v56 = vld [vmem:[#allocation4 + $0x370] sm:$0xff]  ;;  %v344_v57 = vld [vmem:[#allocation4 + $0x358] sm:$0xff] }
 0x1c4   :  { %v348_v58 = vld [vmem:[#allocation4 + $0x378] sm:$0xff]  ;;  %v1346_v61 = vcombine.high %v343_v55, %v347_v56  ;;  %v1345_v3 = vcombine.low %v343_v55, %v347_v56 }
 0x1c5   :  { %v1348_v62 = vcombine.high %v344_v57, %v348_v58  ;;  %v1347_v4 = vcombine.low %v344_v57, %v348_v58 }
 0x1c6   :  { %1134 = vmatpush1.bf16.msra.mxu0 %v1281_v63  ;;  %1175 = vmatpush1.bf16.msra.mxu1 %v1283_v0  ;;  %v335_v63 = vld [vmem:[#allocation4 + $0x310] sm:$0xff] }
 0x1c7   :  { %1135 = vmatprep.subr.bf16.mxu0 %v1274_v1  ;;  %1176 = vmatprep.subr.bf16.mxu1 %v1276_v2  ;;  %v339_v0 = vld [vmem:[#allocation4 + $0x330] sm:$0xff]  ;;  %v336_v1 = vld [vmem:[#allocation4 + $0x318] sm:$0xff] }
 0x1c8   :  { %v340_v2 = vld [vmem:[#allocation4 + $0x338] sm:$0xff]  ;;  %v1338_v5 = vcombine.high %v335_v63, %v339_v0  ;;  %v1337_v11 = vcombine.low %v335_v63, %v339_v0  ;;  %v389_v63 = vsub.s32 5, %v1539_v32  ;;  %v397_v0 = vsub.s32 7, %v1539_v32 }
 0x1c9   :  { %v1340_v6 = vcombine.high %v336_v1, %v340_v2  ;;  %v1339_v12 = vcombine.low %v336_v1, %v340_v2 }
 0x1ca   :  { %1136 = vmatpush1.bf16.msra.mxu0 %v1273_v7  ;;  %1177 = vmatpush1.bf16.msra.mxu1 %v1275_v8  ;;  %v327_v7 = vld [vmem:[#allocation4 + $0x2d0] sm:$0xff] }
 0x1cb   :  { %1137 = vmatprep.subr.bf16.mxu0 %v1266_v9  ;;  %1178 = vmatprep.subr.bf16.mxu1 %v1268_v10  ;;  %v331_v8 = vld [vmem:[#allocation4 + $0x2f0] sm:$0xff]  ;;  %v328_v9 = vld [vmem:[#allocation4 + $0x2d8] sm:$0xff] }
 0x1cc   :  { %v332_v10 = vld [vmem:[#allocation4 + $0x2f8] sm:$0xff]  ;;  %v1330_v13 = vcombine.high %v327_v7, %v331_v8  ;;  %v1329_v22 = vcombine.low %v327_v7, %v331_v8 }
 0x1cd   :  { %v1332_v15 = vcombine.high %v328_v9, %v332_v10  ;;  %v1331_v23 = vcombine.low %v328_v9, %v332_v10 }
 0x1ce   :  { %1138 = vmatpush1.bf16.msra.mxu0 %v1265_v16  ;;  %1179 = vmatpush1.bf16.msra.mxu1 %v1267_v18  ;;  %v319_v16 = vld [vmem:[#allocation4 + $0x290] sm:$0xff] }
 0x1cf   :  { %1139 = vmatprep.subr.bf16.mxu0 %v1258_v19  ;;  %1180 = vmatprep.subr.bf16.mxu1 %v1260_v21  ;;  %v323_v18 = vld [vmem:[#allocation4 + $0x2b0] sm:$0xff]  ;;  %v320_v19 = vld [vmem:[#allocation4 + $0x298] sm:$0xff] }
 0x1d0   :  { %v324_v21 = vld [vmem:[#allocation4 + $0x2b8] sm:$0xff]  ;;  %v1322_v24 = vcombine.high %v319_v16, %v323_v18  ;;  %v1321_v30 = vcombine.low %v319_v16, %v323_v18 }
 0x1d1   :  { %v1324_v25 = vcombine.high %v320_v19, %v324_v21  ;;  %v1323_v31 = vcombine.low %v320_v19, %v324_v21 }
 0x1d2   :  { %1140 = vmatpush1.bf16.msra.mxu0 %v1257_v26  ;;  %1181 = vmatpush1.bf16.msra.mxu1 %v1259_v27  ;;  %v311_v26 = vld [vmem:[#allocation4 + $0x250] sm:$0xff] }
 0x1d3   :  { %1141 = vmatprep.subr.bf16.mxu0 %v1250_v28  ;;  %1182 = vmatprep.subr.bf16.mxu1 %v1252_v29  ;;  %v315_v27 = vld [vmem:[#allocation4 + $0x270] sm:$0xff]  ;;  %v312_v28 = vld [vmem:[#allocation4 + $0x258] sm:$0xff] }
 0x1d4   :  { %v316_v29 = vld [vmem:[#allocation4 + $0x278] sm:$0xff]  ;;  %v1314_v34 = vcombine.high %v311_v26, %v315_v27  ;;  %v1313_v38 = vcombine.low %v311_v26, %v315_v27 }
 0x1d5   :  { %v1316_v14 = vcombine.high %v312_v28, %v316_v29  ;;  %v1315_v39 = vcombine.low %v312_v28, %v316_v29 }
 0x1d6   :  { %1142 = vmatpush1.bf16.msra.mxu0 %v1249_v17  ;;  %1183 = vmatpush1.bf16.msra.mxu1 %v1251_v20  ;;  %v303_v17 = vld [vmem:[#allocation4 + $0x210] sm:$0xff] }
 0x1d7   :  { %1143 = vmatprep.subr.bf16.mxu0 %v1242_v36  ;;  %1184 = vmatprep.subr.bf16.mxu1 %v1244_v37  ;;  %v307_v20 = vld [vmem:[#allocation4 + $0x230] sm:$0xff]  ;;  %v304_v36 = vld [vmem:[#allocation4 + $0x218] sm:$0xff] }
 0x1d8   :  { %v308_v37 = vld [vmem:[#allocation4 + $0x238] sm:$0xff]  ;;  %v1306_v40 = vcombine.high %v303_v17, %v307_v20 }
 0x1d9   :  { %v1308_v41 = vcombine.high %v304_v36, %v308_v37 }
 0x1da   :  { %1144 = vmatpush1.bf16.msra.mxu0 %v1241_v42  ;;  %1185 = vmatpush1.bf16.msra.mxu1 %v1243_v43  ;;  %v1305_v42 = vcombine.low %v303_v17, %v307_v20  ;;  %v1307_v43 = vcombine.low %v304_v36, %v308_v37 }
 0x1db   :  { %1145 = vmatprep.subr.bf16.mxu0 %v1362_v44  ;;  %1186 = vmatprep.subr.bf16.mxu1 %v1364_v45  ;;  %v377_v44 = vsub.s32 2, %v1539_v32  ;;  %v365_v45 = vld [vmem:[#allocation6] sm:$0xff] }
 0x1dc   :  { %v370_v47 = vrot.slane %v365_v45, %v140_v33  ;;  %v374_v50 = vrot.slane %v365_v45, %v144_v35 }
 0x1dd   :  { %v378_v49 = vrot.slane %v365_v45, %v377_v44 }
 0x1de   :  { %1146 = vmatpush2.bf16.msra.mxu0 %v1361_v51  ;;  %1187 = vmatpush2.bf16.msra.mxu1 %v1363_v52  ;;  %v382_v51 = vrot.slane %v365_v45, %v381_v46 }
 0x1df   :  { %1147 = vmatprep.subr.bf16.mxu0 %v1354_v53  ;;  %1188 = vmatprep.subr.bf16.mxu1 %v1356_v54 }
 0x1e2   :  { %1148 = vmatpush2.bf16.msra.mxu0 %v1353_v59  ;;  %1189 = vmatpush2.bf16.msra.mxu1 %v1355_v60 }
 0x1e3   :  { %1149 = vmatprep.subr.bf16.mxu0 %v1346_v61  ;;  %1190 = vmatprep.subr.bf16.mxu1 %v1348_v62  ;;  %v385_v61 = vsub.s32 4, %v1539_v32  ;;  %v393_v62 = vsub.s32 6, %v1539_v32 }
 0x1e5   :  { %v386_v1 = vrot.slane %v365_v45, %v385_v61  ;;  %v394_v2 = vrot.slane %v365_v45, %v393_v62 }
 0x1e6   :  { %1150 = vmatpush2.bf16.msra.mxu0 %v1345_v3  ;;  %1191 = vmatpush2.bf16.msra.mxu1 %v1347_v4  ;;  %v390_v3 = vrot.slane %v365_v45, %v389_v63  ;;  %v398_v4 = vrot.slane %v365_v45, %v397_v0 }
 0x1e7   :  { %1151 = vmatprep.subr.bf16.mxu0 %v1338_v5  ;;  %1192 = vmatprep.subr.bf16.mxu1 %v1340_v6 }
 0x1ea   :  { %1152 = vmatpush2.bf16.msra.mxu0 %v1337_v11  ;;  %1193 = vmatpush2.bf16.msra.mxu1 %v1339_v12 }
 0x1eb   :  { %1153 = vmatprep.subr.bf16.mxu0 %v1330_v13  ;;  %1194 = vmatprep.subr.bf16.mxu1 %v1332_v15 }
 0x1ee   :  { %1154 = vmatpush2.bf16.msra.mxu0 %v1329_v22  ;;  %1195 = vmatpush2.bf16.msra.mxu1 %v1331_v23 }
 0x1ef   :  { %1155 = vmatprep.subr.bf16.mxu0 %v1322_v24  ;;  %1196 = vmatprep.subr.bf16.mxu1 %v1324_v25 }
 0x1f2   :  { %1156 = vmatpush2.bf16.msra.mxu0 %v1321_v30  ;;  %1197 = vmatpush2.bf16.msra.mxu1 %v1323_v31 }
 0x1f3   :  { %1157 = vmatprep.subr.bf16.mxu0 %v1314_v34  ;;  %1198 = vmatprep.subr.bf16.mxu1 %v1316_v14 }
 0x1f6   :  { %1158 = vmatpush2.bf16.msra.mxu0 %v1313_v38  ;;  %1199 = vmatpush2.bf16.msra.mxu1 %v1315_v39 }
 0x1f7   :  { %1159 = vmatprep.subr.bf16.mxu0 %v1306_v40  ;;  %1200 = vmatprep.subr.bf16.mxu1 %v1308_v41 }
 0x1fa   :  { %1160 = vmatpush2.bf16.msra.mxu0 %v1305_v42  ;;  %1201 = vmatpush2.bf16.msra.mxu1 %v1307_v43 }
 0x1fd   :  { %1162 = vmatmul.mubr.bf16.vlgmr.msra.gmra.mxu0 %v1550_v48  ;;  %1203 = vmatmul.mubr.bf16.vlgmr.msra.gmra.mxu1 %v1550_v48 }
 0x27d   :  { %v1081_v52 = vpop.f32.mrf.mxu0  ;;  %v1122_v53 = vpop.f32.mrf.mxu1 }
 0x27e   :  { %v1082_v54 = vadd.f32 %v1081_v52, %v370_v47  ;;  %v1123_v55 = vadd.f32 %v1122_v53, %v378_v49 }
 0x27f   :  { %v1083_v56 = vpop.f32.mrf.mxu0  ;;  %v1124_v57 = vpop.f32.mrf.mxu1 }
 0x280   :  { %1211 = vst [vmem:[%s1597_s7] sm:$0xff] %v1082_v54  ;;  %1213 = vst [vmem:[%s1597_s7 + $0x10] sm:$0xff] %v1123_v55  ;;  %v1084_v33 = vadd.f32 %v1083_v56, %v374_v50  ;;  %v1125_v48 = vadd.f32 %v1124_v57, %v382_v51 }
 0x281   :  { %v1085_v58 = vpop.f32.mrf.mxu0  ;;  %v1126_v59 = vpop.f32.mrf.mxu1 }
 0x282   :  { %1212 = vst [vmem:[%s1597_s7 + $0x8] sm:$0xff] %v1084_v33  ;;  %1214 = vst [vmem:[%s1597_s7 + $0x18] sm:$0xff] %v1125_v48 }
 0x283   :  { %v1086_v35 = vpop.f32.mrf.mxu0  ;;  %v1127_v60 = vpop.f32.mrf.mxu1 }
 0x2bd   :  { %v1163_v5 = vpop.f32.mrf.mxu0  ;;  %v1204_v6 = vpop.f32.mrf.mxu1 }
 0x2be   :  { %v1164_v7 = vadd.f32 %v1163_v5, %v386_v1  ;;  %v1205_v8 = vadd.f32 %v1204_v6, %v394_v2 }
 0x2bf   :  { %v1165_v9 = vpop.f32.mrf.mxu0  ;;  %v1206_v10 = vpop.f32.mrf.mxu1 }
 0x2c0   :  { %1215 = vst [vmem:[%s1597_s7 + $0x20] sm:$0xff] %v1164_v7  ;;  %1217 = vst [vmem:[%s1597_s7 + $0x30] sm:$0xff] %v1205_v8  ;;  %v1166_v11 = vadd.f32 %v1165_v9, %v390_v3  ;;  %v1207_v32 = vadd.f32 %v1206_v10, %v398_v4 }
 0x2c1   :  { %v1167_v12 = vpop.f32.mrf.mxu0  ;;  %v1208_v13 = vpop.f32.mrf.mxu1 }
 0x2c2   :  { %1216 = vst [vmem:[%s1597_s7 + $0x28] sm:$0xff] %v1166_v11  ;;  %1218 = vst [vmem:[%s1597_s7 + $0x38] sm:$0xff] %v1207_v32 }
 0x2c3   :  { %v1168_v15 = vpop.f32.mrf.mxu0  ;;  %v1209_v16 = vpop.f32.mrf.mxu1 }
 0x2c4   :  { %1223 = vsyncpa [#allocation3], 1 }
 0x2c5   :  { %1224 = vsyncpa [#allocation5], 1 }

</bundles_post_ra>
